<compile_context>
chip_gen: v5e
topology: v5e:2x2
jax: 0.10.0
libtpu: 0.0.40
codegen_flags: <defaults>
</compile_context>

<pallas_src>
import functools

import numpy as np
import jax
import jax.numpy as jnp
from jax.experimental import pallas as pl
from jax.experimental.pallas import tpu as pltpu


_ROWS = 8          # sublane-aligned number of loss rows (>= number of terms)
_MAX_TILE = 8192   # lanes per grid step (multiple of 128)


# ----------------------------- Pallas kernel ------------------------------- #
def _fused_weighted_l1_kernel(d_ref, w_ref, out_ref):
    # d/w: (_ROWS, tile_l) f32 lane-dense tiles; padding carries zero weight.
    # out: (_ROWS, 1) f32 output block, resident across the reduction axis and
    # used directly as the accumulator (P3 pattern).
    @pl.when(pl.program_id(0) == 0)
    def _():
        out_ref[...] = jnp.zeros_like(out_ref)

    out_ref[...] += jnp.sum(w_ref[...] * jnp.abs(d_ref[...]),
                            axis=1, keepdims=True)


def _round_up(x, m):
    return ((x + m - 1) // m) * m


def fused_weighted_l1(diff_rows, w_rows):
    """Per-term sum of w * |d| for up to _ROWS independent 1-D terms.

    diff_rows / w_rows: lists (one entry per loss term) of 1-D f32 arrays of
    equal per-term length.  Returns a (n_terms,) vector of per-term sums,
    computed with a single pallas_call in a lane-dense (8, L) layout.
    """
    n_terms = len(diff_rows)
    assert 0 < n_terms <= _ROWS
    max_len = max(int(d.shape[0]) for d in diff_rows)
    l_pad = _round_up(max(max_len, 128), 128)
    tile_l = min(l_pad, _MAX_TILE)
    l_pad = _round_up(l_pad, tile_l)
    grid = (l_pad // tile_l,)

    def build_slab(rows):
        padded = [jnp.pad(r.astype(jnp.float32), (0, l_pad - r.shape[0]))
                  for r in rows]
        slab = jnp.stack(padded, axis=0)                        # (n_terms, L)
        return jnp.pad(slab, ((0, _ROWS - n_terms), (0, 0)))    # (_ROWS,  L)

    d_slab = build_slab(diff_rows)
    w_slab = build_slab(w_rows)   # zero weight in every padded element/row

    out = pl.pallas_call(
        _fused_weighted_l1_kernel,
        out_shape=jax.ShapeDtypeStruct((_ROWS, 1), jnp.float32),
        grid_spec=pltpu.PrefetchScalarGridSpec(
            num_scalar_prefetch=0,
            grid=grid,
            in_specs=[pl.BlockSpec((_ROWS, tile_l), lambda i: (0, i))] * 2,
            out_specs=pl.BlockSpec((_ROWS, 1), lambda i: (0, 0)),
        ),
        compiler_params=pltpu.CompilerParams(
            dimension_semantics=("arbitrary",)),
    )(d_slab, w_slab)
    return out[:n_terms, 0]


# ------------------------- KeypointLosses.forward --------------------------- #
def keypoint_losses_forward(est_kp2d, gt_kp2d, est_kp3d, gt_kp3d, *,
                            indices, connections, centering_indices,
                            per_joint_weights,
                            joints_2d_weight, joints_3d_weight,
                            edge_2d_weight, edge_3d_weight,
                            use_pallas=True):
    conn0 = connections[:, 0]
    conn1 = connections[:, 1]
    terms = []   # (name, est (B,K,C), gt (B,K,C), conf (B,K), loss_weight)

    # ---- 2D joint loss ----
    if joints_2d_weight > 0:
        conf2d = gt_kp2d[:, indices, -1] * per_joint_weights[None, :]
        terms.append(("joints_2d_loss", est_kp2d[:, indices],
                      gt_kp2d[:, indices, :-1], conf2d, joints_2d_weight))

    # ---- 2D edge (bone-vector) loss ----
    if edge_2d_weight > 0:
        e_est = est_kp2d[:, conn1] - est_kp2d[:, conn0]
        e_gt = gt_kp2d[:, conn1, :-1] - gt_kp2d[:, conn0, :-1]
        e_w = gt_kp2d[:, conn0, -1] * gt_kp2d[:, conn1, -1]
        terms.append(("edge_2d_loss", e_est, e_gt, e_w, edge_2d_weight))

    # ---- 3D losses ----
    if gt_kp3d is not None:
        conf = gt_kp3d[:, :, -1]
        if len(centering_indices) > 0:
            est_center = jnp.mean(est_kp3d[:, centering_indices, :], axis=1,
                                  keepdims=True)
            centered_pred = est_kp3d - est_center
            gt_center = jnp.mean(gt_kp3d[:, centering_indices, :-1], axis=1,
                                 keepdims=True)
            centered_gt = gt_kp3d[:, :, :-1] - gt_center
        else:
            # TODO(synk): the original code overwrites `conf` with the xyz
            # coordinates in this branch (likely a bug); we keep the confidence
            # channel instead.
            centered_pred = est_kp3d
            centered_gt = gt_kp3d[:, :, :-1]

        if joints_3d_weight > 0:
            terms.append(("joints_3d_loss", centered_pred[:, indices],
                          centered_gt[:, indices], conf[:, indices],
                          joints_3d_weight))

        if edge_3d_weight > 0:
            e3_est = est_kp3d[:, conn1] - est_kp3d[:, conn0]
            e3_gt = gt_kp3d[:, conn1, :-1] - gt_kp3d[:, conn0, :-1]
            e3_w = gt_kp3d[:, conn0, -1] * gt_kp3d[:, conn1, -1]
            terms.append(("edge_3d_loss", e3_est, e3_gt, e3_w, edge_3d_weight))

    if not terms:
        return {}

    if use_pallas:
        d_rows, w_rows = [], []
        for _, est, gt, conf, lw in terms:
            n_elems = est.size   # static
            diff = est.astype(jnp.float32) - gt.astype(jnp.float32)
            w_elem = (jnp.broadcast_to(conf[..., None].astype(jnp.float32),
                                       est.shape)
                      * (lw / n_elems))     # fold loss weight + mean norm
            d_rows.append(diff.reshape(-1))
            w_rows.append(w_elem.reshape(-1))
        sums = fused_weighted_l1(d_rows, w_rows)
        return {name: sums[t] for t, (name, *_rest) in enumerate(terms)}

    # Pure-XLA path (reference; also preferable for very small reductions).
    return {name: lw * jnp.mean(conf[..., None].astype(jnp.float32)
                                * jnp.abs(est.astype(jnp.float32)
                                          - gt.astype(jnp.float32)))
            for name, est, gt, conf, lw in terms}


# ---------------------------------- main ------------------------------------ #
if __name__ == "__main__":
    key = jax.random.PRNGKey(0)
    B, K = 2, 16                                  # batch, total keypoints
    k1, k2, k3, k4, k5, k6 = jax.random.split(key, 6)

    est_kp2d = jax.random.normal(k1, (B, K, 2), dtype=jnp.float32)
    gt_xy = jax.random.normal(k2, (B, K, 2), dtype=jnp.float32)
    conf2d = jax.random.uniform(k3, (B, K, 1), dtype=jnp.float32)
    gt_kp2d = jnp.concatenate([gt_xy, conf2d], axis=-1)       # (B, K, 3)

    est_kp3d = jax.random.normal(k4, (B, K, 3), dtype=jnp.float32)
    gt_xyz = jax.random.normal(k5, (B, K, 3), dtype=jnp.float32)
    conf3d = jax.random.uniform(k6, (B, K, 1), dtype=jnp.float32)
    gt_kp3d = jnp.concatenate([gt_xyz, conf3d], axis=-1)      # (B, K, 4)

    # part indices / skeleton connections (deterministic, synthetic "body" part)
    indices = np.arange(12, dtype=np.int32)
    connections = np.array(
        [[0, 1], [1, 2], [2, 3], [3, 4], [1, 5], [5, 6], [6, 7], [1, 8],
         [8, 9], [9, 10], [10, 11], [8, 12], [12, 13], [13, 14], [14, 15]],
        dtype=np.int32)
    centering_indices = [8, 9]                    # e.g. left/right hip
    per_joint_weights = jnp.linspace(0.5, 1.5, len(indices), dtype=jnp.float32)

    cfg = dict(indices=indices, connections=connections,
               centering_indices=centering_indices,
               per_joint_weights=per_joint_weights,
               joints_2d_weight=1.0, joints_3d_weight=1.0,
               edge_2d_weight=0.5, edge_3d_weight=0.5)

    fwd = jax.jit(functools.partial(keypoint_losses_forward, **cfg,
                                    use_pallas=True))
    losses = fwd(est_kp2d, gt_kp2d, est_kp3d, gt_kp3d)
    losses = jax.tree_util.tree_map(jax.block_until_ready, losses)

    ref = keypoint_losses_forward(est_kp2d, gt_kp2d, est_kp3d, gt_kp3d,
                                  use_pallas=False, **cfg)
    for name in sorted(losses):
        np.testing.assert_allclose(np.asarray(losses[name]),
                                   np.asarray(ref[name]),
                                   rtol=1e-5, atol=1e-6)

    print("KERNEL_OK")
</pallas_src>

<mosaic_0001>
module attributes {stable_mosaic.version = 11 : i64} {
  func.func @_fused_weighted_l1_kernel(%arg0: i32, %arg1: memref<8x128xf32, #tpu.memory_space<vmem>>, %arg2: memref<8x128xf32, #tpu.memory_space<vmem>>, %arg3: memref<8x1xf32, #tpu.memory_space<vmem>>) attributes {dimension_semantics = [#tpu.dimension_semantics<arbitrary>], iteration_bounds = array<i64: 1>, scalar_prefetch = 0 : i64, scratch_operands = 0 : i64, tpu.core_type = #tpu.core_type<tc>, window_params = [{transform_indices = @transform_0, window_bounds = array<i64: 8, 128>}, {transform_indices = @transform_1, window_bounds = array<i64: 8, 128>}, {pipeline_mode = #tpu.pipeline_mode<synchronous>, transform_indices = @transform_2, window_bounds = array<i64: 8, 1>}]} {
    %c0_i32 = arith.constant 0 : i32
    %0 = arith.cmpi eq, %arg0, %c0_i32 : i32
    %1 = arith.extui %0 : i1 to i32
    %c0_i32_0 = arith.constant 0 : i32
    %2 = arith.cmpi ne, %1, %c0_i32_0 : i32
    scf.if %2 {
      %cst_8 = arith.constant 0.000000e+00 : f32
      %12 = vector.broadcast %cst_8 : f32 to vector<8x1xf32>
      %c0_9 = arith.constant 0 : index
      %c0_10 = arith.constant 0 : index
      %13 = vector.load %arg3[%c0_9, %c0_10] : memref<8x1xf32, #tpu.memory_space<vmem>>, vector<8x1xf32>
      tpu.vector_store %arg3[%c0_9, %c0_10], %12 {strides = array<i32>} : memref<8x1xf32, #tpu.memory_space<vmem>>, vector<8x1xf32>,
    } else {
    }
    %c0 = arith.constant 0 : index
    %c0_1 = arith.constant 0 : index
    %3 = vector.load %arg3[%c0, %c0_1] : memref<8x1xf32, #tpu.memory_space<vmem>>, vector<8x1xf32>
    %c0_2 = arith.constant 0 : index
    %c0_3 = arith.constant 0 : index
    %4 = vector.load %arg2[%c0_2, %c0_3] : memref<8x128xf32, #tpu.memory_space<vmem>>, vector<8x128xf32>
    %c0_4 = arith.constant 0 : index
    %c0_5 = arith.constant 0 : index
    %5 = vector.load %arg1[%c0_4, %c0_5] : memref<8x128xf32, #tpu.memory_space<vmem>>, vector<8x128xf32>
    %6 = math.absf %5 : vector<8x128xf32>
    %7 = arith.mulf %4, %6 : vector<8x128xf32>
    %cst = arith.constant dense<0.000000e+00> : vector<8xf32>
    %8 = vector.multi_reduction <add>, %7, %cst [1] : vector<8x128xf32> to vector<8xf32>
    %9 = vector.shape_cast %8 : vector<8xf32> to vector<8x1xf32>
    %10 = arith.addf %3, %9 : vector<8x1xf32>
    %c0_6 = arith.constant 0 : index
    %c0_7 = arith.constant 0 : index
    %11 = vector.load %arg3[%c0_6, %c0_7] : memref<8x1xf32, #tpu.memory_space<vmem>>, vector<8x1xf32>
    tpu.vector_store %arg3[%c0_6, %c0_7], %10 {strides = array<i32>} : memref<8x1xf32, #tpu.memory_space<vmem>>, vector<8x1xf32>,
    return
  }
  func.func @transform_0(%arg0: i32) -> (i32, i32) {
    %c0_i32 = arith.constant 0 : i32
    %c0_i32_0 = arith.constant 0 : i32
    return %c0_i32, %arg0 : i32, i32
  }
  func.func @transform_1(%arg0: i32) -> (i32, i32) {
    %c0_i32 = arith.constant 0 : i32
    %c0_i32_0 = arith.constant 0 : i32
    return %c0_i32, %arg0 : i32, i32
  }
  func.func @transform_2(%arg0: i32) -> (i32, i32) {
    %c0_i32 = arith.constant 0 : i32
    %c0_i32_0 = arith.constant 0 : i32
    %c0_i32_1 = arith.constant 0 : i32
    return %c0_i32, %c0_i32_0 : i32, i32
  }
}

</mosaic_0001>

<bundles_post_ra>
// kernel: keypoint_losses_forward.1
= control target key start
LH: loop header
LB: loop body
LE: loop exit
PB: predicated region body
PF: predicated region fallthrough
CT: control target
= control target key end

     0   :  { %vm15_vm0 = vcmask 7168   ;;  %v32_v2 = vmov 0.0   ;;  %s63_s0 = inlined_call_operand.vmem [shape: f32[8,128], index: 0, kind: input, shape index: {}]   ;;  %s64_s1 = inlined_call_operand.vmem [shape: f32[8,128], index: 1, kind: input, shape index: {}]   ;;  %s65_s2 = inlined_call_operand.vmem [shape: f32[8,1], index: 2, kind: output, shape index: {}]  }
   0x1   :  { %v18_v0 = vld [vmem:[%s64_s1] sm:$0xff]  ;;  %16 = vst.msk [vmem:[%s65_s2] sm:$0xff] %vm15_vm0, %v32_v2 }
   0x2   :  { %v19_v1 = vld [vmem:[%s63_s0] sm:$0xff] }
   0x3   :  { %v20_v3 = vand.u32 2147483647, %v19_v1 }
   0x5   :  { %v21_v4 = vmul.f32 %v20_v3, %v18_v0 }
   0x7   :  { %22 = vadd.xlane.f32.xlu0 %v21_v4 }
   0x8   :  { %v17_v5 = vld [vmem:[%s65_s2] sm:$0xff] }
  0x7a   :  { %v23_v6 = vpop.xlane.xlu0 %22 }
  0x7b   :  { %v24_v7 = vadd.f32 %v23_v6, %v17_v5 }
  0x7d   :  { %26 = vst.msk [vmem:[%s65_s2] sm:$0xff] %vm15_vm0, %v24_v7 }

</bundles_post_ra>
